<compile_context>
chip_gen: v7x
topology: tpu7x:2x2x1
jax: 0.10.0
libtpu: 0.0.40
codegen_flags: <defaults>
</compile_context>

<pallas_src>
import jax
import jax.numpy as jnp
from jax.experimental import pallas as pl
from jax.experimental.pallas import tpu as pltpu


def ui_encoder_kernel(ids_ref,                    # SMEM (B,) int32  (scalar prefetch)
                      emb_ref,                    # HBM  (V, E)      (pl.ANY)
                      w1t_ref, b1_ref, a1_ref,    # VMEM (E,A), (1,A), (A,F)
                      watt_ref,                   # VMEM (B, R, F)
                      out_ref,                    # VMEM (B, F)
                      idbuf, sem):                # scratch: VMEM (B,E), DMA sems (B,)
    B = out_ref.shape[0]

    # ---- fused embedding gather: per-row DMA HBM -> VMEM --------------------
    copies = []
    for b in range(B):                            # B is a small static constant
        cp = pltpu.make_async_copy(
            emb_ref.at[pl.ds(ids_ref[b], 1)],     # (1, E) row of the table
            idbuf.at[pl.ds(b, 1)],
            sem.at[b],
        )
        cp.start()
        copies.append(cp)
    for cp in copies:
        cp.wait()

    idv = idbuf[...]                                                   # (B, E)

    # ---- Linear + ReLU, attention query -------------------------------------
    qr = jnp.maximum(
        jnp.dot(idv, w1t_ref[...], preferred_element_type=jnp.float32)
        + b1_ref[...],
        0.0,
    )                                                                  # (B, A)
    e = jnp.dot(qr, a1_ref[...], preferred_element_type=jnp.float32)   # (B, F)

    # ---- review attention (lane axis = F, lane-dense slab) ------------------
    watt = watt_ref[...]                                               # (B, R, F)
    s = jnp.sum(watt * e[:, None, :], axis=-1)                         # (B, R)
    p = jnp.exp(s - jnp.max(s, axis=-1, keepdims=True))
    beta = p * pl.reciprocal(jnp.sum(p, axis=-1, keepdims=True),
                             approx=True)                              # (B, R)
    q = jnp.sum(watt * beta[:, :, None], axis=1)                       # (B, F)
    out_ref[...] = q.astype(out_ref.dtype)


def prepare_params(params):
    """One-time layout prep (hoisted out of the per-call path)."""
    emb, w1, b1, a1 = params
    return emb, jnp.transpose(w1), b1.reshape(1, -1), a1  # emb, (E,A), (1,A), (A,F)


def ui_encoder_forward(word_att, ids, prepped):
    emb, w1t, b1_2d, a1 = prepped
    B, F_, R = word_att.shape
    E = emb.shape[1]
    A = w1t.shape[1]

    # Layout plumbing: (B, F, R) -> (B, R, F) so the slab's lane axis is F.
    watt = jnp.transpose(word_att, (0, 2, 1))
    ids = ids.astype(jnp.int32)

    grid_spec = pltpu.PrefetchScalarGridSpec(
        num_scalar_prefetch=1,
        grid=(1,),
        in_specs=[
            pl.BlockSpec(memory_space=pl.ANY),                     # emb stays in HBM
            pl.BlockSpec((E, A), lambda i, ids_ref: (0, 0)),
            pl.BlockSpec((1, A), lambda i, ids_ref: (0, 0)),
            pl.BlockSpec((A, F_), lambda i, ids_ref: (0, 0)),
            pl.BlockSpec((B, R, F_), lambda i, ids_ref: (0, 0, 0)),
        ],
        out_specs=pl.BlockSpec((B, F_), lambda i, ids_ref: (0, 0)),
        scratch_shapes=[
            pltpu.VMEM((B, E), jnp.float32),
            pltpu.SemaphoreType.DMA((B,)),
        ],
    )

    q2d = pl.pallas_call(
        ui_encoder_kernel,
        out_shape=jax.ShapeDtypeStruct((B, F_), jnp.float32),
        grid_spec=grid_spec,
        compiler_params=pltpu.CompilerParams(
            dimension_semantics=("arbitrary",)),
    )(ids, emb, w1t, b1_2d, a1, watt)

    # Match torch output shape (B, F, 1)
    return q2d[:, :, None]


def ui_encoder_reference(word_att, ids, params):
    emb, w1, b1, a1 = params
    id_vec = jnp.take(emb, ids, axis=0)
    qr = jax.nn.relu(id_vec @ w1.T + b1)
    e = (qr @ a1)[:, None, :]                                   # (B,1,F)
    e = jnp.einsum("bif,bfr->bir", e, word_att)                 # (B,1,R)
    beta = jax.nn.softmax(e, axis=2)
    q = jnp.einsum("bfr,bir->bfi", word_att, beta)              # (B,F,1)
    return q


if __name__ == "__main__":
    # module hyperparams
    conv_kernel_num = 32    # F
    id_matrix_len = 100     # V
    id_embedding_dim = 32   # E
    atten_vec_dim = 16      # A
    B, R = 2, 8             # batch, num reviews

    key = jax.random.PRNGKey(0)
    k_emb, k_w1, k_b1, k_a1, k_watt, k_ids = jax.random.split(key, 6)

    emb = jax.random.normal(k_emb, (id_matrix_len, id_embedding_dim), jnp.float32)
    w1 = jax.random.normal(k_w1, (atten_vec_dim, id_embedding_dim), jnp.float32) * 0.1
    b1 = jax.random.normal(k_b1, (atten_vec_dim,), jnp.float32) * 0.1
    a1 = jax.random.normal(k_a1, (atten_vec_dim, conv_kernel_num), jnp.float32) * 0.1
    params = (emb, w1, b1, a1)
    prepped = prepare_params(params)    # one-time; not in the per-call path

    word_att = jax.random.normal(k_watt, (B, conv_kernel_num, R), jnp.float32)
    ids = jax.random.randint(k_ids, (B,), 0, id_matrix_len, jnp.int32)

    fwd = jax.jit(ui_encoder_forward)
    out = jax.block_until_ready(fwd(word_att, ids, prepped))

    ref = ui_encoder_reference(word_att, ids, params)
    assert out.shape == (B, conv_kernel_num, 1)
    assert jnp.allclose(out, ref, atol=2e-3, rtol=2e-3), (
        "max abs diff = %f" % float(jnp.max(jnp.abs(out - ref))))

    print("KERNEL_OK")
</pallas_src>

<mosaic_0001>
module attributes {stable_mosaic.version = 11 : i64} {
  func.func @ui_encoder_kernel(%arg0: i32, %arg1: memref<2xi32, #tpu.memory_space<smem>>, %arg2: memref<100x32xf32, #tpu.memory_space<any>>, %arg3: memref<32x16xf32, #tpu.memory_space<vmem>>, %arg4: memref<1x16xf32, #tpu.memory_space<vmem>>, %arg5: memref<16x32xf32, #tpu.memory_space<vmem>>, %arg6: memref<2x8x32xf32, #tpu.memory_space<vmem>>, %arg7: memref<2x32xf32, #tpu.memory_space<vmem>>, %arg8: memref<2x32xf32, #tpu.memory_space<vmem>>, %arg9: memref<2x!tpu.dma_semaphore, #tpu.memory_space<semaphore_mem>>) attributes {dimension_semantics = [#tpu.dimension_semantics<arbitrary>], iteration_bounds = array<i64: 1>, scalar_prefetch = 1 : i64, scratch_operands = 2 : i64, tpu.core_type = #tpu.core_type<tc>, window_params = [{}, {pipeline_mode = #tpu.pipeline_mode<synchronous>, transform_indices = @transform_1, window_bounds = array<i64: 32, 16>}, {pipeline_mode = #tpu.pipeline_mode<synchronous>, transform_indices = @transform_2, window_bounds = array<i64: 1, 16>}, {pipeline_mode = #tpu.pipeline_mode<synchronous>, transform_indices = @transform_3, window_bounds = array<i64: 16, 32>}, {pipeline_mode = #tpu.pipeline_mode<synchronous>, transform_indices = @transform_4, window_bounds = array<i64: 2, 8, 32>}, {pipeline_mode = #tpu.pipeline_mode<synchronous>, transform_indices = @transform_5, window_bounds = array<i64: 2, 32>}]} {
    %c0 = arith.constant 0 : index
    %0 = memref.load %arg1[%c0] : memref<2xi32, #tpu.memory_space<smem>>
    %c0_i32 = arith.constant 0 : i32
    %c0_i32_0 = arith.constant 0 : i32
    %1 = tpu.memref_slice %arg2[%0, %c0_i32_0] : memref<100x32xf32, #tpu.memory_space<any>> -> memref<1x32xf32, #tpu.memory_space<any>>
    %c0_i32_1 = arith.constant 0 : i32
    %c0_i32_2 = arith.constant 0 : i32
    %2 = tpu.memref_slice %arg8[%c0_i32_1, %c0_i32_2] : memref<2x32xf32, #tpu.memory_space<vmem>> -> memref<1x32xf32, #tpu.memory_space<vmem>>
    %3 = tpu.memref_slice %arg9[%c0_i32] : memref<2x!tpu.dma_semaphore, #tpu.memory_space<semaphore_mem>> -> memref<1x!tpu.dma_semaphore, #tpu.memory_space<semaphore_mem>>
    %4 = tpu.memref_squeeze %3 : memref<1x!tpu.dma_semaphore, #tpu.memory_space<semaphore_mem>> -> memref<!tpu.dma_semaphore, #tpu.memory_space<semaphore_mem>>
    tpu.enqueue_dma source(%1 : memref<1x32xf32, #tpu.memory_space<any>>) target(%2 : memref<1x32xf32, #tpu.memory_space<vmem>>) target_semaphore(%4 : memref<!tpu.dma_semaphore, #tpu.memory_space<semaphore_mem>>)
    %c1 = arith.constant 1 : index
    %5 = memref.load %arg1[%c1] : memref<2xi32, #tpu.memory_space<smem>>
    %c1_i32 = arith.constant 1 : i32
    %c0_i32_3 = arith.constant 0 : i32
    %6 = tpu.memref_slice %arg2[%5, %c0_i32_3] : memref<100x32xf32, #tpu.memory_space<any>> -> memref<1x32xf32, #tpu.memory_space<any>>
    %c1_i32_4 = arith.constant 1 : i32
    %c0_i32_5 = arith.constant 0 : i32
    %7 = tpu.memref_slice %arg8[%c1_i32_4, %c0_i32_5] : memref<2x32xf32, #tpu.memory_space<vmem>> -> memref<1x32xf32, #tpu.memory_space<vmem>>
    %8 = tpu.memref_slice %arg9[%c1_i32] : memref<2x!tpu.dma_semaphore, #tpu.memory_space<semaphore_mem>> -> memref<1x!tpu.dma_semaphore, #tpu.memory_space<semaphore_mem>>
    %9 = tpu.memref_squeeze %8 : memref<1x!tpu.dma_semaphore, #tpu.memory_space<semaphore_mem>> -> memref<!tpu.dma_semaphore, #tpu.memory_space<semaphore_mem>>
    tpu.enqueue_dma source(%6 : memref<1x32xf32, #tpu.memory_space<any>>) target(%7 : memref<1x32xf32, #tpu.memory_space<vmem>>) target_semaphore(%9 : memref<!tpu.dma_semaphore, #tpu.memory_space<semaphore_mem>>)
    %c0_i32_6 = arith.constant 0 : i32
    %c0_i32_7 = arith.constant 0 : i32
    %10 = tpu.memref_slice %arg2[%0, %c0_i32_7] : memref<100x32xf32, #tpu.memory_space<any>> -> memref<1x32xf32, #tpu.memory_space<any>>
    %c0_i32_8 = arith.constant 0 : i32
    %c0_i32_9 = arith.constant 0 : i32
    %11 = tpu.memref_slice %arg8[%c0_i32_8, %c0_i32_9] : memref<2x32xf32, #tpu.memory_space<vmem>> -> memref<1x32xf32, #tpu.memory_space<vmem>>
    %12 = tpu.memref_slice %arg9[%c0_i32_6] : memref<2x!tpu.dma_semaphore, #tpu.memory_space<semaphore_mem>> -> memref<1x!tpu.dma_semaphore, #tpu.memory_space<semaphore_mem>>
    %13 = tpu.memref_squeeze %12 : memref<1x!tpu.dma_semaphore, #tpu.memory_space<semaphore_mem>> -> memref<!tpu.dma_semaphore, #tpu.memory_space<semaphore_mem>>
    tpu.wait_dma2 semaphore(%13 : memref<!tpu.dma_semaphore, #tpu.memory_space<semaphore_mem>>) src(%10 : memref<1x32xf32, #tpu.memory_space<any>>) dst(%11 : memref<1x32xf32, #tpu.memory_space<vmem>>)
    %c1_i32_10 = arith.constant 1 : i32
    %c0_i32_11 = arith.constant 0 : i32
    %14 = tpu.memref_slice %arg2[%5, %c0_i32_11] : memref<100x32xf32, #tpu.memory_space<any>> -> memref<1x32xf32, #tpu.memory_space<any>>
    %c1_i32_12 = arith.constant 1 : i32
    %c0_i32_13 = arith.constant 0 : i32
    %15 = tpu.memref_slice %arg8[%c1_i32_12, %c0_i32_13] : memref<2x32xf32, #tpu.memory_space<vmem>> -> memref<1x32xf32, #tpu.memory_space<vmem>>
    %16 = tpu.memref_slice %arg9[%c1_i32_10] : memref<2x!tpu.dma_semaphore, #tpu.memory_space<semaphore_mem>> -> memref<1x!tpu.dma_semaphore, #tpu.memory_space<semaphore_mem>>
    %17 = tpu.memref_squeeze %16 : memref<1x!tpu.dma_semaphore, #tpu.memory_space<semaphore_mem>> -> memref<!tpu.dma_semaphore, #tpu.memory_space<semaphore_mem>>
    tpu.wait_dma2 semaphore(%17 : memref<!tpu.dma_semaphore, #tpu.memory_space<semaphore_mem>>) src(%14 : memref<1x32xf32, #tpu.memory_space<any>>) dst(%15 : memref<1x32xf32, #tpu.memory_space<vmem>>)
    %c0_14 = arith.constant 0 : index
    %c0_15 = arith.constant 0 : index
    %18 = vector.load %arg8[%c0_14, %c0_15] : memref<2x32xf32, #tpu.memory_space<vmem>>, vector<2x32xf32>
    %c0_16 = arith.constant 0 : index
    %c0_17 = arith.constant 0 : index
    %19 = vector.load %arg3[%c0_16, %c0_17] : memref<32x16xf32, #tpu.memory_space<vmem>>, vector<32x16xf32>
    %cst = arith.constant dense<0.000000e+00> : vector<2x16xf32>
    %20 = tpu.matmul %18, %19, %cst {dimension_numbers = #tpu.dot_dimension_numbers<[1], [0], [0], [1], [0, 0, 1, 1], [], []>} : vector<2x32xf32>, vector<32x16xf32>, vector<2x16xf32> -> vector<2x16xf32>
    %c0_18 = arith.constant 0 : index
    %c0_19 = arith.constant 0 : index
    %21 = vector.load %arg4[%c0_18, %c0_19] : memref<1x16xf32, #tpu.memory_space<vmem>>, vector<1x16xf32>
    %22 = vector.broadcast %21 : vector<1x16xf32> to vector<2x16xf32>
    %23 = arith.addf %20, %22 : vector<2x16xf32>
    %cst_20 = arith.constant 0.000000e+00 : f32
    %24 = vector.broadcast %cst_20 : f32 to vector<2x16xf32>
    %25 = arith.maximumf %23, %24 : vector<2x16xf32>
    %c0_21 = arith.constant 0 : index
    %c0_22 = arith.constant 0 : index
    %26 = vector.load %arg5[%c0_21, %c0_22] : memref<16x32xf32, #tpu.memory_space<vmem>>, vector<16x32xf32>
    %cst_23 = arith.constant dense<0.000000e+00> : vector<2x32xf32>
    %27 = tpu.matmul %25, %26, %cst_23 {dimension_numbers = #tpu.dot_dimension_numbers<[1], [0], [0], [1], [0, 0, 1, 1], [], []>} : vector<2x16xf32>, vector<16x32xf32>, vector<2x32xf32> -> vector<2x32xf32>
    %c0_24 = arith.constant 0 : index
    %c0_25 = arith.constant 0 : index
    %c0_26 = arith.constant 0 : index
    %28 = vector.load %arg6[%c0_24, %c0_25, %c0_26] : memref<2x8x32xf32, #tpu.memory_space<vmem>>, vector<2x8x32xf32>
    %29 = vector.shape_cast %27 : vector<2x32xf32> to vector<2x1x32xf32>
    %30 = vector.broadcast %29 : vector<2x1x32xf32> to vector<2x8x32xf32>
    %31 = arith.mulf %28, %30 : vector<2x8x32xf32>
    %cst_27 = arith.constant dense<0.000000e+00> : vector<2x8xf32>
    %32 = vector.multi_reduction <add>, %31, %cst_27 [2] : vector<2x8x32xf32> to vector<2x8xf32>
    %cst_28 = arith.constant dense<0xFF800000> : vector<2xf32>
    %33 = vector.multi_reduction <maximumf>, %32, %cst_28 [1] : vector<2x8xf32> to vector<2xf32>
    %34 = vector.shape_cast %33 : vector<2xf32> to vector<2x1xf32>
    %35 = vector.broadcast %34 : vector<2x1xf32> to vector<2x8xf32>
    %36 = arith.subf %32, %35 : vector<2x8xf32>
    %37 = math.exp %36 : vector<2x8xf32>
    %cst_29 = arith.constant dense<0.000000e+00> : vector<2xf32>
    %38 = vector.multi_reduction <add>, %37, %cst_29 [1] : vector<2x8xf32> to vector<2xf32>
    %39 = vector.shape_cast %38 : vector<2xf32> to vector<2x1xf32>
    %40 = tpu.reciprocal %39 {approx = true} : vector<2x1xf32> -> vector<2x1xf32>
    %41 = vector.broadcast %40 : vector<2x1xf32> to vector<2x8xf32>
    %42 = arith.mulf %37, %41 : vector<2x8xf32>
    %43 = vector.shape_cast %42 : vector<2x8xf32> to vector<2x8x1xf32>
    %44 = vector.broadcast %43 : vector<2x8x1xf32> to vector<2x8x32xf32>
    %45 = arith.mulf %28, %44 : vector<2x8x32xf32>
    %cst_30 = arith.constant dense<0.000000e+00> : vector<2x32xf32>
    %46 = vector.multi_reduction <add>, %45, %cst_30 [1] : vector<2x8x32xf32> to vector<2x32xf32>
    %c0_31 = arith.constant 0 : index
    %c0_32 = arith.constant 0 : index
    %47 = vector.load %arg7[%c0_31, %c0_32] : memref<2x32xf32, #tpu.memory_space<vmem>>, vector<2x32xf32>
    tpu.vector_store %arg7[%c0_31, %c0_32], %46 {strides = array<i32>} : memref<2x32xf32, #tpu.memory_space<vmem>>, vector<2x32xf32>,
    return
  }
  func.func @transform_1(%arg0: i32, %arg1: memref<2xi32, #tpu.memory_space<smem>>) -> (i32, i32) {
    %c0_i32 = arith.constant 0 : i32
    %c0_i32_0 = arith.constant 0 : i32
    %c0_i32_1 = arith.constant 0 : i32
    return %c0_i32, %c0_i32_0 : i32, i32
  }
  func.func @transform_2(%arg0: i32, %arg1: memref<2xi32, #tpu.memory_space<smem>>) -> (i32, i32) {
    %c0_i32 = arith.constant 0 : i32
    %c0_i32_0 = arith.constant 0 : i32
    %c0_i32_1 = arith.constant 0 : i32
    return %c0_i32, %c0_i32_0 : i32, i32
  }
  func.func @transform_3(%arg0: i32, %arg1: memref<2xi32, #tpu.memory_space<smem>>) -> (i32, i32) {
    %c0_i32 = arith.constant 0 : i32
    %c0_i32_0 = arith.constant 0 : i32
    %c0_i32_1 = arith.constant 0 : i32
    return %c0_i32, %c0_i32_0 : i32, i32
  }
  func.func @transform_4(%arg0: i32, %arg1: memref<2xi32, #tpu.memory_space<smem>>) -> (i32, i32, i32) {
    %c0_i32 = arith.constant 0 : i32
    %c0_i32_0 = arith.constant 0 : i32
    %c0_i32_1 = arith.constant 0 : i32
    %c0_i32_2 = arith.constant 0 : i32
    return %c0_i32, %c0_i32_0, %c0_i32_1 : i32, i32, i32
  }
  func.func @transform_5(%arg0: i32, %arg1: memref<2xi32, #tpu.memory_space<smem>>) -> (i32, i32) {
    %c0_i32 = arith.constant 0 : i32
    %c0_i32_0 = arith.constant 0 : i32
    %c0_i32_1 = arith.constant 0 : i32
    return %c0_i32, %c0_i32_0 : i32, i32
  }
}

</mosaic_0001>

<bundles_post_ra>
// kernel: ui_encoder_forward.1
= control target key start
LH: loop header
LB: loop body
LE: loop exit
PB: predicated region body
PF: predicated region fallthrough
CT: control target
= control target key end

     0   :  { %s682_s0 = inlined_call_operand.vmem [shape: s32[2], index: 0, kind: input, shape index: {}]   ;;  %s683_s1 = inlined_call_operand.vmem [shape: f32[100,32], index: 1, kind: input, shape index: {}]   ;;  %s684_s2 = inlined_call_operand.vmem [shape: f32[32,16], index: 2, kind: input, shape index: {}]   ;;  %s685_s3 = inlined_call_operand.vmem [shape: f32[1,16], index: 3, kind: input, shape index: {}]   ;;  %s686_s4 = inlined_call_operand.vmem [shape: f32[16,32], index: 4, kind: input, shape index: {}]   ;;  %s687_s5 = inlined_call_operand.vmem [shape: f32[2,8,32], index: 5, kind: input, shape index: {}]   ;;  %s688_s6 = inlined_call_operand.hbm [shape: f32[2,32], index: 6, kind: output, shape index: {}]  }
   0x1   :  { %s11_s23 = sshll.u32 %s682_s0, 4  ;;  %s12_s23 = int_to_ptr.vmem [resolvable:$true] %s11_s23 }
   0x2   :  { %s540_s24 = scalar_lea.vmem %s12_s23, 16  ;;  %p545_p1 = scmp.lt.s32.totalorder %s12_s23, %s12_s23 }
   0x3   :  { %p541_p0 = scmp.ne.s32.totalorder %s12_s23, %s540_s24  ;;  %p546_p2 = scmp.lt.s32.totalorder %s540_s24, %s540_s24 }
   0x5   :  { %p547_p3 = por %p546_p2, %p545_p1 }
   0x7   :  { %p548_p4 = pnand %p547_p3, %p541_p0 }
   0x9   :  { %551 = shalt.err (!%p548_p4)  }
   0xa   :  { %s582_s25 = smov [#allocation5]  }
   0xb   :  { %14 = dma.vmem_to_smem %s12_s23, 16, %s582_s25, [#allocation4] }
   0xc   :  { %574 = dma.done.wait [#allocation4], 16 }
   0xd   :  { %575 = vsyncadd [#allocation4], 4294967280 }
   0xe   :  { %16 = sfence }
   0xf   :  { %17 = vsyncpa [#allocation7], 0  ;;  %s26_s26 = sld [smem:[#allocation5]] }
  0x15   :  { %s27_s29 = scalar_lea.vmem %s683_s1, %s26_s26 }
  0x16   :  { %v45_v0 = vld [vmem:[%s27_s29] sm:$0x1] }
  0x17   :  { %46 = vst [vmem:[#allocation2] sm:$0x1] %v45_v0 }
  0x18   :  { %71 = vsyncadd [#allocation3], 16  ;;  %s484_s0 = sld [smem:[#allocation5 + $0x1]] }
  0x1e   :  { %s73_s8 = scalar_lea.vmem %s683_s1, %s484_s0 }
  0x1f   :  { %v93_v1 = vld [vmem:[%s73_s8] sm:$0x1] }
  0x20   :  { %94 = vst [vmem:[#allocation2 + $0x1] sm:$0x1] %v93_v1 }
  0x21   :  { %119 = vsyncadd [#allocation3 + $0x1], 16 }
  0x22   :  { %576 = dma.done.wait [#allocation3], 16 }
  0x23   :  { %577 = vsyncadd [#allocation3], 4294967280 }
  0x24   :  { %578 = dma.done.wait [#allocation3 + $0x1], 16 }
  0x25   :  { %579 = vsyncadd [#allocation3 + $0x1], 4294967280  ;;  %v583_v2 = vmov 0.0|0.0   ;;  %vm584_vm0 = vmmov 0   ;;  %v585_v3 = vmov 0.0   ;;  %v126_v4 = vld [vmem:[%s684_s2] sm:$0xff]  ;;  %v294_v21 = vlaneseq }
  0x26   :  { %516 = vmatprep.subr.bf16.mxu0 %v583_v2  ;;  %506 = vmatprep.mubr.msk.f32.mxu0 %vm584_vm0, %v585_v3  ;;  %v127_v5 = vld [vmem:[%s684_s2 + $0x8] sm:$0xff]  ;;  %v128_v6 = vld [vmem:[%s684_s2 + $0x10] sm:$0xff]  ;;  %v129_v8 = vld [vmem:[%s684_s2 + $0x18] sm:$0xff]  ;;  %vm137_vm1 = vcmask 261120   ;;  %vm214_vm2 = vcmask 130048   ;;  %vm343_vm3 = vcmask 1041409  }
  0x27   :  { %522 = vmatprep.subr.bf16.mxu1 %v583_v2  ;;  %513 = vmatprep.mubr.msk.f32.mxu1 %vm584_vm0, %v585_v3  ;;  %v517_v7 = vpack.c.bf16 %v127_v5, %v126_v4  ;;  %v520_v9 = vpack.c.bf16 %v129_v8, %v128_v6  ;;  %v125_v10 = vld [vmem:[#allocation2] sm:$0x3]  ;;  %v213_v12 = vld [vmem:[%s686_s4 + $0x8] sm:$0xff]  ;;  %v586_v19 = vmov 1966171168   ;;  %v295_v23 = vshrl.u32 %v294_v21, 7 }
  0x28   :  { %v212_v11 = vld [vmem:[%s686_s4] sm:$0xff]  ;;  %v292_v20 = vunpack.c.l.s4 %v586_v19  ;;  %v289_v34 = vld [vmem:[%s687_s5 + $0x8] sm:$0xff]  ;;  %v334_v40 = vand.u32 127, %v294_v21  ;;  %vm346_vm4 = vcmask 58368   ;;  %v587_v48 = vmov 0  }
  0x29   :  { %518 = vmatpush3.bf16.msra.mxu0 %v517_v7  ;;  %v523_v13 = vpack.c.bf16 %v213_v12, %v212_v11  ;;  %v485_v14 = vld [vmem:[%s685_s3] ss:$0 sm:$0xff]  ;;  %v315_v28 = vsub.s32 0, %v295_v23  ;;  %533 = vset.pattern.permute.xlu0 %v587_v48  ;;  %v357_v49 = vsub.s32 1, %v295_v23  ;;  %vm432_vm5 = vcmask 254976  }
  0x2a   :  { %519 = vmatprep.subr.bf16.mxu0 %v583_v2  ;;  %v293_v22 = vunpack.c.0.s8 %v292_v20  ;;  %v288_v31 = vld [vmem:[%s687_s5] sm:$0xff]  ;;  %v337_v42 = vsub.s32 %v334_v40, %v295_v23  ;;  %532 = vset.pattern.permute.xlu1 %v587_v48  ;;  %s588_s5 = smov [#allocation6]  }
  0x2b   :  { %524 = vmatpush3.bf16.msra.mxu1 %v523_v13  ;;  %s440_s23 = sshll.u32 %s588_s5, 4  ;;  %s441_s23 = int_to_ptr.vmem [resolvable:$true] %s440_s23 }
  0x2c   :  { %v296_v24 = vsub.s32 %v293_v22, %v295_v23  ;;  %s552_s24 = scalar_lea.vmem %s441_s23, 32  ;;  %p557_p6 = scmp.lt.s32.totalorder %s441_s23, %s441_s23 }
  0x2d   :  { %521 = vmatpush3.bf16.msra.mxu0 %v520_v9  ;;  %p553_p5 = scmp.ne.s32.totalorder %s441_s23, %s552_s24  ;;  %p558_p7 = scmp.lt.s32.totalorder %s552_s24, %s552_s24 }
  0x2f   :  { %p559_p8 = por %p558_p7, %p557_p6 }
  0x30   :  { %507 = vmatmul.mubr.msk.f32.vlgmr.msra.gmra.mrb[0].mxu0 %vm137_vm1, %v125_v10 }
  0x31   :  { %p560_p9 = pnand %p559_p8, %p553_p5 }
 0x103   :  { %v207_v15 = vpop.f32.mrb[0].mxu0 }
 0x104   :  { %v208_v16 = vadd.f32 %v485_v14, %v207_v15  ;;  %v508_v17 = vpop.f32.mrb[1].mxu0 }
 0x106   :  { %v211_v18 = vmax.f32 %v208_v16, 0.0 }
 0x108   :  { %514 = vmatmul.mubr.msk.f32.vlgmr.msra.gmra.mrb[0].mxu1 %vm214_vm2, %v211_v18 }
 0x1db   :  { %v284_v25 = vpop.f32.mrb[0].mxu1 }
 0x1dc   :  { %v297_v26 = vrot.slane %v284_v25, %v296_v24  ;;  %v515_v27 = vpop.f32.mrb[1].mxu1 }
 0x1de   :  { %v298_v29 = vcombine.high %v297_v26, %v297_v26  ;;  %v305_v30 = vrot.slane %v297_v26, %v296_v24 }
 0x1e0   :  { %v312_v32 = vrot.slane %v298_v29, %v296_v24  ;;  %v316_v33 = vrot.slane %v305_v30, %v315_v28 }
 0x1e2   :  { %v323_v35 = vmul.f32 %v316_v33, %v288_v31  ;;  %v320_v36 = vrot.slane %v312_v32, %v315_v28 }
 0x1e4   :  { %v325_v37 = vsel %vm137_vm1, %v323_v35, 0.0  ;;  %v324_v38 = vmul.f32 %v320_v36, %v289_v34 }
 0x1e5   :  { %326 = vadd.xlane.f32.xlu0 %v325_v37 }
 0x1e6   :  { %v328_v39 = vsel %vm137_vm1, %v324_v38, 0.0 }
 0x1e9   :  { %329 = vadd.xlane.f32.xlu0 %v328_v39 }
 0x272   :  { %v327_v41 = vpop.xlane.xlu0 %326 }
 0x273   :  { %v338_v44 = vrot.slane %v327_v41, %v337_v42 }
 0x276   :  { %v330_v43 = vpop.xlane.xlu0 %329 }
 0x277   :  { %v342_v45 = vrot.slane %v330_v43, %v337_v42 }
 0x279   :  { %v344_v46 = vsel %vm343_vm3, %v342_v45, %v338_v44 }
 0x27a   :  { %v347_v47 = vsel %vm346_vm4, %v344_v46, -inf }
 0x27b   :  { %348 = vmax.xlane.f32.xlu1 %v347_v47 }
 0x308   :  { %v349_v50 = vpop.xlane.xlu1 %348 }
 0x309   :  { %v354_v51 = vrot.slane %v349_v50, %v315_v28  ;;  %v358_v52 = vrot.slane %v349_v50, %v357_v49 }
 0x30b   :  { %v361_v53 = vsub.f32 %v327_v41, %v354_v51  ;;  %v362_v54 = vsub.f32 %v330_v43, %v358_v52 }
 0x30d   :  { %v363_v55 = vmul.f32 1.442695, %v361_v53  ;;  %v365_v56 = vmul.f32 1.442695, %v362_v54 }
 0x30f   :  { %534 = vpow2.f32 %v363_v55 }
 0x310   :  { %536 = vpow2.f32 %v365_v56 }
 0x319   :  { %v535_v57 = vpop.eup %534 }
 0x31a   :  { %v537_v58 = vpop.eup %536  ;;  %370 = vperm.xlu1 %532, %v535_v57  }
 0x31b   :  { %373 = vperm.xlu0 %533, %v537_v58  }
 0x399   :  { %v371_v59 = vpop.permute.xlu1 %370 }
 0x39a   :  { %v374_v60 = vpop.permute.xlu0 %373  ;;  %v378_v61 = vrot.slane %v371_v59, %v337_v42 }
 0x39b   :  { %v382_v62 = vrot.slane %v374_v60, %v337_v42 }
 0x39d   :  { %v383_v63 = vsel %vm343_vm3, %v382_v62, %v378_v61 }
 0x39e   :  { %v385_v0 = vsel %vm346_vm4, %v383_v63, 0.0 }
 0x39f   :  { %386 = vadd.xlane.f32.xlu1 %v385_v0 }
 0x42c   :  { %v387_v1 = vpop.xlane.xlu1 %386 }
 0x42d   :  { %538 = vrcp.f32 %v387_v1 }
 0x437   :  { %v539_v2 = vpop.eup %538 }
 0x438   :  { %v393_v3 = vrot.slane %v539_v2, %v315_v28  ;;  %v397_v5 = vrot.slane %v539_v2, %v357_v49 }
 0x43a   :  { %v400_v4 = vmul.f32 %v535_v57, %v393_v3  ;;  %v401_v6 = vmul.f32 %v537_v58, %v397_v5 }
 0x43c   :  { %404 = vperm.xlu0 %533, %v400_v4  }
 0x440   :  { %409 = vperm.xlu0 %533, %v401_v6  }
 0x4bb   :  { %v405_v7 = vpop.permute.xlu0 %404 }
 0x4bc   :  { %v412_v8 = vmul.f32 %v405_v7, %v288_v31 }
 0x4be   :  { %v414_v9 = vsel %vm137_vm1, %v412_v8, 0.0 }
 0x4bf   :  { %v415_v10 = vrot.slane %v414_v9, 4  ;;  %v410_v11 = vpop.permute.xlu0 %409 }
 0x4c0   :  { %v413_v12 = vmul.f32 %v410_v11, %v289_v34 }
 0x4c1   :  { %v416_v13 = vadd.f32 %v415_v10, %v414_v9 }
 0x4c2   :  { %v421_v14 = vsel %vm137_vm1, %v413_v12, 0.0 }
 0x4c3   :  { %v417_v15 = vrot.slane %v416_v13, 2  ;;  %v422_v16 = vrot.slane %v421_v14, 4 }
 0x4c5   :  { %v418_v17 = vadd.f32 %v417_v15, %v416_v13  ;;  %v423_v18 = vadd.f32 %v422_v16, %v421_v14 }
 0x4c7   :  { %v424_v19 = vrot.slane %v423_v18, 2  ;;  %v419_v20 = vrot.slane %v418_v17, 1 }
 0x4c9   :  { %v425_v21 = vadd.f32 %v424_v19, %v423_v18  ;;  %v420_v23 = vadd.f32 %v419_v20, %v418_v17 }
 0x4cb   :  { %v426_v22 = vrot.slane %v425_v21, 1 }
 0x4cd   :  { %v427_v24 = vadd.f32 %v426_v22, %v425_v21 }
 0x4cf   :  { %v430_v25 = vsel %vm343_vm3, %v427_v24, %v420_v23 }
 0x4d0   :  { %433 = vst.msk [vmem:[#allocation6] sm:$0x3] %vm432_vm5, %v430_v25 }
 0x4d1   :  { %563 = shalt.err (!%p560_p9)
}
 0x4d2   :  { %s564_s27 = scalar_lea.hbm %s688_s6, 32 }
 0x4d3   :  { %p565_p10 = scmp.ne.s32.totalorder %s688_s6, %s564_s27  ;;  %p568_p11 = scmp.lt.u32.totalorder %s564_s27, %s688_s6 }
 0x4d5   :  { %p570_p12 = pnand %p568_p11, %p565_p10 }
 0x4d7   :  { %573 = shalt.err (!%p570_p12)
}
 0x4d8   :  { %443 = dma.vmem_to_hbm [thread:$0]  %s441_s23, 32, %s688_s6, [#allocation7]  }
 0x4d9   :  { %580 = dma.done.wait [#allocation7], 32  }
 0x4da   :  { %581 = vsyncadd [#allocation7], 4294967264 }
 0x4db   :  { %447 = vsyncpa [#allocation7], 1 }
 0x4dc   :  { %448 = vsyncmov [#allocation3] }
 0x4df   :  { %s449_s9 = vpop.sfrf %448 }
 0x4e0   :  { %p488_p13 = scmp.ne.s32.totalorder %s449_s9, 0 }
 0x4e2   :  { %453 = shalt.err (%p488_p13)  }
 0x4e3   :  { %455 = vsyncmov [#allocation3 + $0x1] }
 0x4e6   :  { %s456_s10 = vpop.sfrf %455 }
 0x4e7   :  { %p489_p0 = scmp.ne.s32.totalorder %s456_s10, 0 }
 0x4e9   :  { %460 = shalt.err (%p489_p0)  }

</bundles_post_ra>
